<compile_context>
chip_gen: v6e
topology: v6e:2x2x1
jax: 0.10.0
libtpu: 0.0.40
codegen_flags: <defaults>
</compile_context>

<pallas_src>
import math

import jax
import jax.numpy as jnp
import numpy as np
from jax.experimental import pallas as pl
from jax.experimental.pallas import tpu as pltpu


def _choose_mode_tile(m):
    """Pick a lane-dense mode tile (multiple of 128) minimizing zero-padding."""
    best_tm, best_key = None, None
    for tm in (512, 384, 256, 128):
        m_pad = tm * ((m + tm - 1) // tm)
        key = (m_pad, -tm)          # least padding, then largest tile
        if best_key is None or key < best_key:
            best_key, best_tm = key, tm
    return best_tm, best_key[0]


def _spectral_mul_kernel(x_ref, w_ref, o_ref):
    # x_ref: (2, B, Ci, TM) re/im; w_ref: (2, Ci, Co, TM); o_ref: (2, B, Co, TM)
    _, B, Ci, TM = x_ref.shape
    Co = w_ref.shape[2]
    acc_r = jnp.zeros((B, Co, TM), jnp.float32)
    acc_i = jnp.zeros((B, Co, TM), jnp.float32)
    # Complex contraction over input channels, statically unrolled (Ci small).
    # Per-channel ref reads (not whole-block hoists) keep vreg pressure to the
    # two accumulators + one x row + one w row, letting vld overlap VALU.
    for i in range(Ci):
        xr = x_ref[0, :, i:i + 1, :]      # (B, 1, TM)  sublane broadcast
        xi = x_ref[1, :, i:i + 1, :]
        wr = w_ref[0, i:i + 1, :, :]      # (1, Co, TM) leading-dim broadcast
        wi = w_ref[1, i:i + 1, :, :]
        acc_r = acc_r + xr * wr - xi * wi
        acc_i = acc_i + xr * wi + xi * wr
    o_ref[0] = acc_r
    o_ref[1] = acc_i


def spectral_mul_packed(x_packed, w_packed, tile_m):
    """x_packed: (2, 2, B, Ci, M_pad) f32; w_packed: (2, 2, Ci, Co, M_pad) f32.
    Returns (2, 2, B, Co, M_pad) f32 with
      out[c, :, b, o, m] = complex-sum_i x[c, :, b, i, m] * w[c, :, i, o, m]."""
    _, _, B, Ci, Mp = x_packed.shape
    Co = w_packed.shape[3]
    assert Mp % tile_m == 0
    grid = (2, Mp // tile_m)              # (corner, mode-tile) — both parallel

    # Advisory cost for XLA scheduling around the custom call.
    flops = 2 * B * Ci * Co * Mp * 8      # 4 mul + 4 add per complex MAC
    bytes_accessed = 4 * (x_packed.size + w_packed.size + 2 * 2 * B * Co * Mp)
    cost = pl.CostEstimate(flops=flops, transcendentals=0,
                           bytes_accessed=int(bytes_accessed))

    # Cap VMEM: per-step blocks x ~double-buffering, kept <= 64 MiB (v7x safe).
    block_bytes = 4 * tile_m * (2 * B * Ci + 2 * Ci * Co + 2 * B * Co)
    vmem_limit = int(min(64 * 1024 * 1024,
                         max(32 * 1024 * 1024, 3 * block_bytes)))

    grid_spec = pltpu.PrefetchScalarGridSpec(
        num_scalar_prefetch=0,
        grid=grid,
        in_specs=[
            # NOTE: weight index_map is independent of batch; if B is ever
            # tiled, keep the B-tile axis innermost so the weight tile stays
            # resident across consecutive B steps (no re-DMA).
            pl.BlockSpec((None, 2, B, Ci, tile_m), lambda c, m: (c, 0, 0, 0, m)),
            pl.BlockSpec((None, 2, Ci, Co, tile_m), lambda c, m: (c, 0, 0, 0, m)),
        ],
        out_specs=pl.BlockSpec((None, 2, B, Co, tile_m),
                               lambda c, m: (c, 0, 0, 0, m)),
    )
    return pl.pallas_call(
        _spectral_mul_kernel,
        out_shape=jax.ShapeDtypeStruct((2, 2, B, Co, Mp), jnp.float32),
        grid_spec=grid_spec,
        compiler_params=pltpu.CompilerParams(
            dimension_semantics=("parallel", "parallel"),
            vmem_limit_bytes=vmem_limit),
        cost_estimate=cost,
    )(x_packed, w_packed)


class FourierLiftProj:
    """JAX/Pallas port of the PyTorch FourierLiftProj module."""

    def __init__(self, in_channels, out_channels, n_modes, key):
        self.in_channels = in_channels
        self.out_channels = out_channels
        self.n_mode_1, self.n_mode_2 = n_modes
        # PyTorch init: weights are complex; kaiming_normal_ on the .real view,
        # imaginary parts stay zero (scale * 0 = 0).
        fan_in = out_channels * self.n_mode_1 * self.n_mode_2
        std = math.sqrt(2.0) / math.sqrt(fan_in)
        k1, k2 = jax.random.split(key, 2)
        shape = (in_channels, out_channels, self.n_mode_1, self.n_mode_2)
        w1_real = std * jax.random.normal(k1, shape, jnp.float32)
        w2_real = std * jax.random.normal(k2, shape, jnp.float32)
        self.weight_1 = jax.lax.complex(w1_real, jnp.zeros_like(w1_real))
        self.weight_2 = jax.lax.complex(w2_real, jnp.zeros_like(w2_real))

        # Precompute the packed / mode-padded weight slab ONCE (no per-forward
        # stack+reshape+real/imag round trip of the largest operand).
        self.m_modes = self.n_mode_1 * self.n_mode_2
        self.tile_m, self.m_pad = _choose_mode_tile(self.m_modes)
        w_c = jnp.stack([self.weight_1, self.weight_2], axis=0).reshape(
            2, in_channels, out_channels, self.m_modes)
        w_packed = jnp.stack([jnp.real(w_c), jnp.imag(w_c)],
                             axis=1).astype(jnp.float32)       # (2,2,Ci,Co,M)
        if self.m_pad > self.m_modes:
            w_packed = jnp.pad(
                w_packed,
                ((0, 0), (0, 0), (0, 0), (0, 0), (0, self.m_pad - self.m_modes)))
        # TODO(synk): optionally store bf16 weights on v6e/v7x (keep f32 accum)
        # to halve weight HBM traffic when bandwidth-bound.
        self.w_packed = w_packed

    def forward(self, x):
        B, Ci, H, W = x.shape
        # FFT has no clean Pallas equivalent; XLA's FFT op is used as glue.
        x_ft = jnp.fft.rfft2(x, norm='ortho')                 # (B, Ci, H, Wf)
        Wf = W // 2 + 1
        n1 = min(H // 2, self.n_mode_1)
        n2 = min(Wf, self.n_mode_2)
        # (PyTorch einsum requires the slice to match the weight mode dims.)
        assert n1 == self.n_mode_1 and n2 == self.n_mode_2
        M = n1 * n2

        top = x_ft[:, :, :n1, :n2].reshape(B, Ci, M)          # low-freq rows
        bot = x_ft[:, :, H - n1:, :n2].reshape(B, Ci, M)      # high-freq rows
        x_c = jnp.stack([top, bot], axis=0)                   # (2, B, Ci, M)
        x_packed = jnp.stack([jnp.real(x_c), jnp.imag(x_c)],
                             axis=1).astype(jnp.float32)      # (2,2,B,Ci,M)
        if self.m_pad > M:
            # Zero-pad modes so padded lanes contribute exactly zero.
            x_packed = jnp.pad(
                x_packed, ((0, 0), (0, 0), (0, 0), (0, 0), (0, self.m_pad - M)))

        out_packed = spectral_mul_packed(x_packed, self.w_packed, self.tile_m)
        out = jax.lax.complex(out_packed[:, 0, :, :, :M],
                              out_packed[:, 1, :, :, :M])     # (2, B, Co, M)
        out = out.reshape(2, B, self.out_channels, n1, n2)

        out_ft = jnp.zeros((B, self.out_channels, H, Wf), jnp.complex64)
        out_ft = out_ft.at[:, :, :n1, :n2].set(out[0])
        out_ft = out_ft.at[:, :, H - n1:, :n2].set(out[1])
        return jnp.fft.irfft2(out_ft, s=(H, W), norm='ortho')  # (B, Co, H, W)


def reference_forward_numpy(w1, w2, x, n_modes, out_channels):
    x = np.asarray(x, dtype=np.float32)
    w1 = np.asarray(w1)
    w2 = np.asarray(w2)
    B, Ci, H, W = x.shape
    x_ft = np.fft.rfft2(x, norm='ortho')
    Wf = W // 2 + 1
    n1 = min(H // 2, n_modes[0])
    n2 = min(Wf, n_modes[1])
    out_ft = np.zeros((B, out_channels, H, Wf), dtype=np.complex64)
    out_ft[..., :n1, :n2] = np.einsum('bixy,ioxy->boxy',
                                      x_ft[..., :n1, :n2], w1)
    out_ft[:, :, -n1:, :n2] = np.einsum('bixy,ioxy->boxy',
                                        x_ft[:, :, -n1:, :n2], w2)
    return np.fft.irfft2(out_ft, s=(H, W), norm='ortho')


if __name__ == "__main__":
    key = jax.random.PRNGKey(0)
    k_mod, k_x = jax.random.split(key)

    B, Ci, Co, H, W = 2, 4, 8, 16, 16
    n_modes = (4, 4)

    module = FourierLiftProj(Ci, Co, n_modes, k_mod)
    x = jax.random.normal(k_x, (B, Ci, H, W), jnp.float32)

    y = module.forward(x)
    y = jax.block_until_ready(y)
    assert y.shape == (B, Co, H, W)

    y_ref = reference_forward_numpy(module.weight_1, module.weight_2,
                                    x, n_modes, Co)
    np.testing.assert_allclose(np.asarray(y), y_ref, atol=2e-3, rtol=2e-3)

    print("KERNEL_OK")
</pallas_src>

<mosaic_0001>
module attributes {stable_mosaic.version = 11 : i64} {
  func.func @_spectral_mul_kernel(%arg0: i32, %arg1: i32, %arg2: memref<1x2x2x4x128xf32, #tpu.memory_space<vmem>>, %arg3: memref<1x2x4x8x128xf32, #tpu.memory_space<vmem>>, %arg4: memref<1x2x2x8x128xf32, #tpu.memory_space<vmem>>) attributes {dimension_semantics = [#tpu.dimension_semantics<parallel>, #tpu.dimension_semantics<parallel>], iteration_bounds = array<i64: 2, 1>, scalar_prefetch = 0 : i64, scratch_operands = 0 : i64, tpu.core_type = #tpu.core_type<tc>, window_params = [{transform_indices = @transform_0, window_bounds = array<i64: 1, 2, 2, 4, 128>}, {transform_indices = @transform_1, window_bounds = array<i64: 1, 2, 4, 8, 128>}, {transform_indices = @transform_2, window_bounds = array<i64: 1, 2, 2, 8, 128>}]} {
    %cst = arith.constant 0.000000e+00 : f32
    %0 = vector.broadcast %cst : f32 to vector<2x8x128xf32>
    %cst_0 = arith.constant 0.000000e+00 : f32
    %1 = vector.broadcast %cst_0 : f32 to vector<2x8x128xf32>
    %c0 = arith.constant 0 : index
    %c0_1 = arith.constant 0 : index
    %c0_2 = arith.constant 0 : index
    %c0_3 = arith.constant 0 : index
    %c0_4 = arith.constant 0 : index
    %2 = vector.load %arg2[%c0, %c0_1, %c0_2, %c0_3, %c0_4] : memref<1x2x2x4x128xf32, #tpu.memory_space<vmem>>, vector<1x1x2x1x128xf32>
    %3 = vector.shape_cast %2 : vector<1x1x2x1x128xf32> to vector<2x1x128xf32>
    %c0_5 = arith.constant 0 : index
    %c1 = arith.constant 1 : index
    %c0_6 = arith.constant 0 : index
    %c0_7 = arith.constant 0 : index
    %c0_8 = arith.constant 0 : index
    %4 = vector.load %arg2[%c0_5, %c1, %c0_6, %c0_7, %c0_8] : memref<1x2x2x4x128xf32, #tpu.memory_space<vmem>>, vector<1x1x2x1x128xf32>
    %5 = vector.shape_cast %4 : vector<1x1x2x1x128xf32> to vector<2x1x128xf32>
    %c0_9 = arith.constant 0 : index
    %c0_10 = arith.constant 0 : index
    %c0_11 = arith.constant 0 : index
    %c0_12 = arith.constant 0 : index
    %c0_13 = arith.constant 0 : index
    %6 = vector.load %arg3[%c0_9, %c0_10, %c0_11, %c0_12, %c0_13] : memref<1x2x4x8x128xf32, #tpu.memory_space<vmem>>, vector<1x1x1x8x128xf32>
    %7 = vector.shape_cast %6 : vector<1x1x1x8x128xf32> to vector<1x8x128xf32>
    %c0_14 = arith.constant 0 : index
    %c1_15 = arith.constant 1 : index
    %c0_16 = arith.constant 0 : index
    %c0_17 = arith.constant 0 : index
    %c0_18 = arith.constant 0 : index
    %8 = vector.load %arg3[%c0_14, %c1_15, %c0_16, %c0_17, %c0_18] : memref<1x2x4x8x128xf32, #tpu.memory_space<vmem>>, vector<1x1x1x8x128xf32>
    %9 = vector.shape_cast %8 : vector<1x1x1x8x128xf32> to vector<1x8x128xf32>
    %10 = vector.broadcast %3 : vector<2x1x128xf32> to vector<2x8x128xf32>
    %11 = vector.broadcast %7 : vector<1x8x128xf32> to vector<2x8x128xf32>
    %12 = arith.mulf %10, %11 : vector<2x8x128xf32>
    %13 = arith.addf %0, %12 : vector<2x8x128xf32>
    %14 = vector.broadcast %5 : vector<2x1x128xf32> to vector<2x8x128xf32>
    %15 = vector.broadcast %9 : vector<1x8x128xf32> to vector<2x8x128xf32>
    %16 = arith.mulf %14, %15 : vector<2x8x128xf32>
    %17 = arith.subf %13, %16 : vector<2x8x128xf32>
    %18 = vector.broadcast %3 : vector<2x1x128xf32> to vector<2x8x128xf32>
    %19 = vector.broadcast %9 : vector<1x8x128xf32> to vector<2x8x128xf32>
    %20 = arith.mulf %18, %19 : vector<2x8x128xf32>
    %21 = arith.addf %1, %20 : vector<2x8x128xf32>
    %22 = vector.broadcast %5 : vector<2x1x128xf32> to vector<2x8x128xf32>
    %23 = vector.broadcast %7 : vector<1x8x128xf32> to vector<2x8x128xf32>
    %24 = arith.mulf %22, %23 : vector<2x8x128xf32>
    %25 = arith.addf %21, %24 : vector<2x8x128xf32>
    %c0_19 = arith.constant 0 : index
    %c0_20 = arith.constant 0 : index
    %c0_21 = arith.constant 0 : index
    %c1_22 = arith.constant 1 : index
    %c0_23 = arith.constant 0 : index
    %26 = vector.load %arg2[%c0_19, %c0_20, %c0_21, %c1_22, %c0_23] : memref<1x2x2x4x128xf32, #tpu.memory_space<vmem>>, vector<1x1x2x1x128xf32>
    %27 = vector.shape_cast %26 : vector<1x1x2x1x128xf32> to vector<2x1x128xf32>
    %c0_24 = arith.constant 0 : index
    %c1_25 = arith.constant 1 : index
    %c0_26 = arith.constant 0 : index
    %c1_27 = arith.constant 1 : index
    %c0_28 = arith.constant 0 : index
    %28 = vector.load %arg2[%c0_24, %c1_25, %c0_26, %c1_27, %c0_28] : memref<1x2x2x4x128xf32, #tpu.memory_space<vmem>>, vector<1x1x2x1x128xf32>
    %29 = vector.shape_cast %28 : vector<1x1x2x1x128xf32> to vector<2x1x128xf32>
    %c0_29 = arith.constant 0 : index
    %c0_30 = arith.constant 0 : index
    %c1_31 = arith.constant 1 : index
    %c0_32 = arith.constant 0 : index
    %c0_33 = arith.constant 0 : index
    %30 = vector.load %arg3[%c0_29, %c0_30, %c1_31, %c0_32, %c0_33] : memref<1x2x4x8x128xf32, #tpu.memory_space<vmem>>, vector<1x1x1x8x128xf32>
    %31 = vector.shape_cast %30 : vector<1x1x1x8x128xf32> to vector<1x8x128xf32>
    %c0_34 = arith.constant 0 : index
    %c1_35 = arith.constant 1 : index
    %c1_36 = arith.constant 1 : index
    %c0_37 = arith.constant 0 : index
    %c0_38 = arith.constant 0 : index
    %32 = vector.load %arg3[%c0_34, %c1_35, %c1_36, %c0_37, %c0_38] : memref<1x2x4x8x128xf32, #tpu.memory_space<vmem>>, vector<1x1x1x8x128xf32>
    %33 = vector.shape_cast %32 : vector<1x1x1x8x128xf32> to vector<1x8x128xf32>
    %34 = vector.broadcast %27 : vector<2x1x128xf32> to vector<2x8x128xf32>
    %35 = vector.broadcast %31 : vector<1x8x128xf32> to vector<2x8x128xf32>
    %36 = arith.mulf %34, %35 : vector<2x8x128xf32>
    %37 = arith.addf %17, %36 : vector<2x8x128xf32>
    %38 = vector.broadcast %29 : vector<2x1x128xf32> to vector<2x8x128xf32>
    %39 = vector.broadcast %33 : vector<1x8x128xf32> to vector<2x8x128xf32>
    %40 = arith.mulf %38, %39 : vector<2x8x128xf32>
    %41 = arith.subf %37, %40 : vector<2x8x128xf32>
    %42 = vector.broadcast %27 : vector<2x1x128xf32> to vector<2x8x128xf32>
    %43 = vector.broadcast %33 : vector<1x8x128xf32> to vector<2x8x128xf32>
    %44 = arith.mulf %42, %43 : vector<2x8x128xf32>
    %45 = arith.addf %25, %44 : vector<2x8x128xf32>
    %46 = vector.broadcast %29 : vector<2x1x128xf32> to vector<2x8x128xf32>
    %47 = vector.broadcast %31 : vector<1x8x128xf32> to vector<2x8x128xf32>
    %48 = arith.mulf %46, %47 : vector<2x8x128xf32>
    %49 = arith.addf %45, %48 : vector<2x8x128xf32>
    %c0_39 = arith.constant 0 : index
    %c0_40 = arith.constant 0 : index
    %c0_41 = arith.constant 0 : index
    %c2 = arith.constant 2 : index
    %c0_42 = arith.constant 0 : index
    %50 = vector.load %arg2[%c0_39, %c0_40, %c0_41, %c2, %c0_42] : memref<1x2x2x4x128xf32, #tpu.memory_space<vmem>>, vector<1x1x2x1x128xf32>
    %51 = vector.shape_cast %50 : vector<1x1x2x1x128xf32> to vector<2x1x128xf32>
    %c0_43 = arith.constant 0 : index
    %c1_44 = arith.constant 1 : index
    %c0_45 = arith.constant 0 : index
    %c2_46 = arith.constant 2 : index
    %c0_47 = arith.constant 0 : index
    %52 = vector.load %arg2[%c0_43, %c1_44, %c0_45, %c2_46, %c0_47] : memref<1x2x2x4x128xf32, #tpu.memory_space<vmem>>, vector<1x1x2x1x128xf32>
    %53 = vector.shape_cast %52 : vector<1x1x2x1x128xf32> to vector<2x1x128xf32>
    %c0_48 = arith.constant 0 : index
    %c0_49 = arith.constant 0 : index
    %c2_50 = arith.constant 2 : index
    %c0_51 = arith.constant 0 : index
    %c0_52 = arith.constant 0 : index
    %54 = vector.load %arg3[%c0_48, %c0_49, %c2_50, %c0_51, %c0_52] : memref<1x2x4x8x128xf32, #tpu.memory_space<vmem>>, vector<1x1x1x8x128xf32>
    %55 = vector.shape_cast %54 : vector<1x1x1x8x128xf32> to vector<1x8x128xf32>
    %c0_53 = arith.constant 0 : index
    %c1_54 = arith.constant 1 : index
    %c2_55 = arith.constant 2 : index
    %c0_56 = arith.constant 0 : index
    %c0_57 = arith.constant 0 : index
    %56 = vector.load %arg3[%c0_53, %c1_54, %c2_55, %c0_56, %c0_57] : memref<1x2x4x8x128xf32, #tpu.memory_space<vmem>>, vector<1x1x1x8x128xf32>
    %57 = vector.shape_cast %56 : vector<1x1x1x8x128xf32> to vector<1x8x128xf32>
    %58 = vector.broadcast %51 : vector<2x1x128xf32> to vector<2x8x128xf32>
    %59 = vector.broadcast %55 : vector<1x8x128xf32> to vector<2x8x128xf32>
    %60 = arith.mulf %58, %59 : vector<2x8x128xf32>
    %61 = arith.addf %41, %60 : vector<2x8x128xf32>
    %62 = vector.broadcast %53 : vector<2x1x128xf32> to vector<2x8x128xf32>
    %63 = vector.broadcast %57 : vector<1x8x128xf32> to vector<2x8x128xf32>
    %64 = arith.mulf %62, %63 : vector<2x8x128xf32>
    %65 = arith.subf %61, %64 : vector<2x8x128xf32>
    %66 = vector.broadcast %51 : vector<2x1x128xf32> to vector<2x8x128xf32>
    %67 = vector.broadcast %57 : vector<1x8x128xf32> to vector<2x8x128xf32>
    %68 = arith.mulf %66, %67 : vector<2x8x128xf32>
    %69 = arith.addf %49, %68 : vector<2x8x128xf32>
    %70 = vector.broadcast %53 : vector<2x1x128xf32> to vector<2x8x128xf32>
    %71 = vector.broadcast %55 : vector<1x8x128xf32> to vector<2x8x128xf32>
    %72 = arith.mulf %70, %71 : vector<2x8x128xf32>
    %73 = arith.addf %69, %72 : vector<2x8x128xf32>
    %c0_58 = arith.constant 0 : index
    %c0_59 = arith.constant 0 : index
    %c0_60 = arith.constant 0 : index
    %c3 = arith.constant 3 : index
    %c0_61 = arith.constant 0 : index
    %74 = vector.load %arg2[%c0_58, %c0_59, %c0_60, %c3, %c0_61] : memref<1x2x2x4x128xf32, #tpu.memory_space<vmem>>, vector<1x1x2x1x128xf32>
    %75 = vector.shape_cast %74 : vector<1x1x2x1x128xf32> to vector<2x1x128xf32>
    %c0_62 = arith.constant 0 : index
    %c1_63 = arith.constant 1 : index
    %c0_64 = arith.constant 0 : index
    %c3_65 = arith.constant 3 : index
    %c0_66 = arith.constant 0 : index
    %76 = vector.load %arg2[%c0_62, %c1_63, %c0_64, %c3_65, %c0_66] : memref<1x2x2x4x128xf32, #tpu.memory_space<vmem>>, vector<1x1x2x1x128xf32>
    %77 = vector.shape_cast %76 : vector<1x1x2x1x128xf32> to vector<2x1x128xf32>
    %c0_67 = arith.constant 0 : index
    %c0_68 = arith.constant 0 : index
    %c3_69 = arith.constant 3 : index
    %c0_70 = arith.constant 0 : index
    %c0_71 = arith.constant 0 : index
    %78 = vector.load %arg3[%c0_67, %c0_68, %c3_69, %c0_70, %c0_71] : memref<1x2x4x8x128xf32, #tpu.memory_space<vmem>>, vector<1x1x1x8x128xf32>
    %79 = vector.shape_cast %78 : vector<1x1x1x8x128xf32> to vector<1x8x128xf32>
    %c0_72 = arith.constant 0 : index
    %c1_73 = arith.constant 1 : index
    %c3_74 = arith.constant 3 : index
    %c0_75 = arith.constant 0 : index
    %c0_76 = arith.constant 0 : index
    %80 = vector.load %arg3[%c0_72, %c1_73, %c3_74, %c0_75, %c0_76] : memref<1x2x4x8x128xf32, #tpu.memory_space<vmem>>, vector<1x1x1x8x128xf32>
    %81 = vector.shape_cast %80 : vector<1x1x1x8x128xf32> to vector<1x8x128xf32>
    %82 = vector.broadcast %75 : vector<2x1x128xf32> to vector<2x8x128xf32>
    %83 = vector.broadcast %79 : vector<1x8x128xf32> to vector<2x8x128xf32>
    %84 = arith.mulf %82, %83 : vector<2x8x128xf32>
    %85 = arith.addf %65, %84 : vector<2x8x128xf32>
    %86 = vector.broadcast %77 : vector<2x1x128xf32> to vector<2x8x128xf32>
    %87 = vector.broadcast %81 : vector<1x8x128xf32> to vector<2x8x128xf32>
    %88 = arith.mulf %86, %87 : vector<2x8x128xf32>
    %89 = arith.subf %85, %88 : vector<2x8x128xf32>
    %90 = vector.broadcast %75 : vector<2x1x128xf32> to vector<2x8x128xf32>
    %91 = vector.broadcast %81 : vector<1x8x128xf32> to vector<2x8x128xf32>
    %92 = arith.mulf %90, %91 : vector<2x8x128xf32>
    %93 = arith.addf %73, %92 : vector<2x8x128xf32>
    %94 = vector.broadcast %77 : vector<2x1x128xf32> to vector<2x8x128xf32>
    %95 = vector.broadcast %79 : vector<1x8x128xf32> to vector<2x8x128xf32>
    %96 = arith.mulf %94, %95 : vector<2x8x128xf32>
    %97 = arith.addf %93, %96 : vector<2x8x128xf32>
    %c0_77 = arith.constant 0 : index
    %c0_78 = arith.constant 0 : index
    %c0_79 = arith.constant 0 : index
    %c0_80 = arith.constant 0 : index
    %c0_81 = arith.constant 0 : index
    %98 = vector.load %arg4[%c0_77, %c0_78, %c0_79, %c0_80, %c0_81] : memref<1x2x2x8x128xf32, #tpu.memory_space<vmem>>, vector<1x1x2x8x128xf32>
    %99 = vector.shape_cast %98 : vector<1x1x2x8x128xf32> to vector<2x8x128xf32>
    %100 = vector.shape_cast %89 : vector<2x8x128xf32> to vector<1x1x2x8x128xf32>
    tpu.vector_store %arg4[%c0_77, %c0_78, %c0_79, %c0_80, %c0_81], %100 {strides = array<i32>} : memref<1x2x2x8x128xf32, #tpu.memory_space<vmem>>, vector<1x1x2x8x128xf32>,
    %c0_82 = arith.constant 0 : index
    %c1_83 = arith.constant 1 : index
    %c0_84 = arith.constant 0 : index
    %c0_85 = arith.constant 0 : index
    %c0_86 = arith.constant 0 : index
    %101 = vector.load %arg4[%c0_82, %c1_83, %c0_84, %c0_85, %c0_86] : memref<1x2x2x8x128xf32, #tpu.memory_space<vmem>>, vector<1x1x2x8x128xf32>
    %102 = vector.shape_cast %101 : vector<1x1x2x8x128xf32> to vector<2x8x128xf32>
    %103 = vector.shape_cast %97 : vector<2x8x128xf32> to vector<1x1x2x8x128xf32>
    tpu.vector_store %arg4[%c0_82, %c1_83, %c0_84, %c0_85, %c0_86], %103 {strides = array<i32>} : memref<1x2x2x8x128xf32, #tpu.memory_space<vmem>>, vector<1x1x2x8x128xf32>,
    return
  }
  func.func @transform_0(%arg0: i32, %arg1: i32) -> (i32, i32, i32, i32, i32) {
    %c0_i32 = arith.constant 0 : i32
    %c0_i32_0 = arith.constant 0 : i32
    %c0_i32_1 = arith.constant 0 : i32
    %c0_i32_2 = arith.constant 0 : i32
    return %arg0, %c0_i32, %c0_i32_0, %c0_i32_1, %arg1 : i32, i32, i32, i32, i32
  }
  func.func @transform_1(%arg0: i32, %arg1: i32) -> (i32, i32, i32, i32, i32) {
    %c0_i32 = arith.constant 0 : i32
    %c0_i32_0 = arith.constant 0 : i32
    %c0_i32_1 = arith.constant 0 : i32
    %c0_i32_2 = arith.constant 0 : i32
    return %arg0, %c0_i32, %c0_i32_0, %c0_i32_1, %arg1 : i32, i32, i32, i32, i32
  }
  func.func @transform_2(%arg0: i32, %arg1: i32) -> (i32, i32, i32, i32, i32) {
    %c0_i32 = arith.constant 0 : i32
    %c0_i32_0 = arith.constant 0 : i32
    %c0_i32_1 = arith.constant 0 : i32
    %c0_i32_2 = arith.constant 0 : i32
    return %arg0, %c0_i32, %c0_i32_0, %c0_i32_1, %arg1 : i32, i32, i32, i32, i32
  }
}

</mosaic_0001>

<bundles_post_ra>
// kernel: tpu_custom_call.1
= control target key start
LH: loop header
LB: loop body
LE: loop exit
PB: predicated region body
PF: predicated region fallthrough
CT: control target
= control target key end

     0   :  { %7 = vsyncpa [#allocation3], 0  ;;  %s1017_s0 = inlined_call_operand.hbm [shape: f32[2,2,2,4,128], index: 0, kind: input, shape index: {}]   ;;  %s1018_s1 = inlined_call_operand.hbm [shape: f32[2,2,4,8,128], index: 1, kind: input, shape index: {}]   ;;  %s1019_s2 = inlined_call_operand.hbm [shape: f32[2,2,2,8,128], index: 2, kind: output, shape index: {}]  }
   0x1   :  { %9 = vsyncpa [#allocation3 + $0x1], 0 }
   0x2   :  { %10 = vsyncpa [#allocation6], 0 }
   0x3   :  { %12 = vsyncpa [#allocation6 + $0x1], 0 }
   0x4   :  { %13 = vsyncpa [#allocation4], 0 }
   0x5   :  { %15 = vsyncpa [#allocation4 + $0x1], 0  ;;  %s806_s9 = smov 0   ;;  %s808_s10 = smov 0  }
   0x6   :  { %s810_s11 = smov 0   ;;  %s812_s12 = smov 0  }
   0x7   :  { %s814_s13 = smov 0   ;;  %s816_s14 = smov 0  }
   0x8 LB: > { %s512_s15 = sadd.s32 4294967295, %s780_s14   ;;  %s513_s16 = sadd.s32 4294967294, %s780_s14   ;;  %s780_s14 = sphi %s816_s14, %s21_s14   ;;  %s776_s13 = sphi %s814_s13, %s1030_s13   ;;  %s772_s12 = sphi %s812_s12, %s1029_s12   ;;  %s768_s11 = sphi %s810_s11, %s1028_s11   ;;  %s764_s10 = sphi %s808_s10, %s1027_s10   ;;  %s760_s9 = sphi %s806_s9, %s1026_s9  }
   0x9   : > { %s33_s17 = sadd.s32 1, %s776_s13  ;;  %s42_s18 = sadd.s32 1, %s768_s11 }
   0xa   : > { %p35_p0 = scmp.ge.s32.totalorder %s33_s17, 2  ;;  %p49_p1 = scmp.ne.s32.totalorder %s768_s11, %s764_s10 }
   0xb   : > { %p50_p2 = scmp.eq.s32.totalorder %s780_s14, 0  ;;  %p55_p3 = scmp.ne.s32.totalorder %s764_s10, %s760_s9 }
   0xc   : > { %s1032_s17 = smov (%p35_p0, %s33_s17), 0  ;;  %p56_p5 = scmp.eq.s32.totalorder %s512_s15, 0 }
   0xd   : > { %p847_p4 = por %p50_p2, %p49_p1  ;;  %s37_s20 = ssub.s32 %s776_s13, %s1032_s17 }
   0xe   : > { %p109_p6 = scmp.eq.s32.totalorder %s512_s15, 1  ;;  %p40_p7 = scmp.eq.s32.totalorder %s37_s20, 0 }
   0xf   : > { %p853_p8 = por %p56_p5, %p55_p3  ;;  %p115_p10 = scmp.eq.s32.totalorder %s513_s16, 1 }
  0x10   : > { %p857_p9 = por %p109_p6, %p49_p1  ;;  %p515_p12 = scmp.ge.s32.totalorder %s780_s14, 2 }
  0x11   : > { %s862_s23 = scalar_select %p40_p7, %s768_s11, %s42_s18  }
  0x12   : > { %p864_p11 = por %p115_p10, %p55_p3  ;;  %p584_p13 = scmp.lt.s32.totalorder %s780_s14, 2 }
  0x13   : > { %s871_s25 = sand.u32 1, %s768_s11   ;;  %s564_s27 = sshll.u32 %s776_s13, 8 }
  0x14   : > { %s516_s26 = sshll.u32 %s871_s25, 4  ;;  %s146_s30 = scalar_lea.hbm %s1017_s0, %s564_s27 }
  0x15   : > { %s139_s3 = scalar_lea.vmem [#allocation2], %s516_s26  ;;  %p880_p0 = pnand %p584_p13, %p847_p4 }
  0x16   : > { %s147_s4 = sshll.u32 %s139_s3, 4  ;;  %p522_p1 = scmp.ge.s32.totalorder %s780_s14, 1  ;;  %s148_s4 = int_to_ptr.vmem [resolvable:$true] %s147_s4 }
  0x17   : > { %s136_s6 = scalar_lea.sflag [#allocation3], %s871_s25  ;;  %p642_p2 = pneg %p880_p0 }
  0x18   : > { %s653_s7 = scalar_lea.vmem %s148_s4, 256  ;;  %s782_s8 = smov [#allocation2]  }
  0x19   : > { %p654_p3 = scmp.ne.s32.totalorder %s148_s4, %s653_s7  ;;  %s658_s15 = sshll.u32 %s782_s8, 4  ;;  %s659_s15 = int_to_ptr.vmem [resolvable:$false] %s658_s15 }
  0x1a   : > { %s660_s16 = scalar_lea.vmem %s659_s15, 512  ;;  %p661_p4 = scmp.lt.s32.totalorder %s148_s4, %s659_s15 }
  0x1b   : > { %p656_p5 = pnand %p654_p3, %p642_p2  ;;  %p662_p7 = scmp.lt.s32.totalorder %s660_s16, %s653_s7 }
  0x1d   : > { %p657_p6 = pneg %p656_p5  ;;  %p663_p10 = por %p662_p7, %p661_p4 }
  0x1f   : > { %p664_p13 = pnand %p663_p10, %p657_p6 }
  0x21   : > { %667 = shalt.err (!%p664_p13)
}
  0x22   : > { %s783_s18 = smov 64   ;;  %s784_s19 = smov 4  }
  0x23   : > { %576 = dma.hbm_to_vmem [thread:$0]  (!%p880_p0), %s146_s30, 256, %s148_s4, %s136_s6, %s783_s18, %s783_s18, %s784_s19  }
  0x24   : > { %p177_p3 = scmp.lt.s32.totalorder %s780_s14, 3  ;;  %s519_s20 = sshll.u32 %s871_s25, 6 }
  0x25   : > { %s565_s26 = sshll.u32 %s776_s13, 10  ;;  %s161_s7 = scalar_lea.vmem [#allocation5], %s519_s20 }
  0x26   : > { %p898_p5 = pnand %p522_p1, %p177_p3  ;;  %s168_s3 = scalar_lea.hbm %s1018_s1, %s565_s26 }
  0x27   : > { %s169_s8 = sshll.u32 %s161_s7, 4  ;;  %s158_s15 = scalar_lea.sflag [#allocation6], %s871_s25  ;;  %s170_s8 = int_to_ptr.vmem [resolvable:$true] %s169_s8 }
  0x28   : > { %s681_s16 = scalar_lea.vmem %s170_s8, 1024  ;;  %s785_s30 = smov [#allocation5]  }
  0x29   : > { %p682_p6 = scmp.ne.s32.totalorder %s170_s8, %s681_s16  ;;  %s686_s4 = sshll.u32 %s785_s30, 4  ;;  %s687_s4 = int_to_ptr.vmem [resolvable:$false] %s686_s4 }
  0x2a   : > { %s688_s6 = scalar_lea.vmem %s687_s4, 2048  ;;  %p689_p1 = scmp.lt.s32.totalorder %s170_s8, %s687_s4 }
  0x2b   : > { %p684_p4 = pnand %p682_p6, %p642_p2  ;;  %p690_p10 = scmp.lt.s32.totalorder %s688_s6, %s681_s16 }
  0x2d   : > { %p685_p7 = pneg %p684_p4  ;;  %p691_p13 = por %p690_p10, %p689_p1 }
  0x2f   : > { %p692_p3 = pnand %p691_p13, %p685_p7 }
  0x31   : > { %695 = shalt.err (!%p692_p3)
}
  0x32   : > { %s786_s18 = smov 128   ;;  %s787_s19 = smov 8  }
  0x33   : > { %579 = dma.hbm_to_vmem [thread:$0]  (!%p880_p0), %s168_s3, 1024, %s170_s8, %s158_s15, %s786_s18, %s786_s18, %s787_s19  }
  0x34   : > { %181 = sbr.rel (%p898_p5) target bundleno = 99 (0x63), region = 28  ;;  %s914_s25 = sand.u32 (!%p898_p5), 1, %s764_s10  }
  0x35   : > { %s523_s20 = sshll.u32 (!%p898_p5), %s914_s25, 4  ;;  %s184_s26 = scalar_lea.sflag (!%p898_p5), [#allocation3], %s914_s25 }
  0x36   : > { %s918_s28 = scalar_lea.vmem (!%p898_p5), [#allocation2], %s523_s20 }
  0x39   : > { %747 = dma.done.wait (%p853_p8), %s184_s26, 256  }
  0x3a   : > { %749 = vsyncadd (%p853_p8), %s184_s26, 4294967040  ;;  %s524_s5 = sshll.u32 %s914_s25, 6  ;;  %s193_s27 = scalar_lea.sflag [#allocation6], %s914_s25 }
  0x3b   : > { %s926_s29 = scalar_lea.vmem [#allocation5], %s524_s5 }
  0x3c   : > { %751 = dma.done.wait (%p853_p8), %s193_s27, 1024  }
  0x3d   : > { %753 = vsyncadd (%p853_p8), %s193_s27, 4294966272  ;;  %v529_v0 = vld [vmem:[%s918_s28] ss:$0 sm:$0xff]  ;;  %v531_v1 = vld [vmem:[%s918_s28 + $0x8] ss:$0 sm:$0xff]  ;;  %s525_s21 = sshll.u32 %s914_s25, 5 }
  0x3e   : > { %v227_v2 = vld [vmem:[%s926_s29] sm:$0xff]  ;;  %v539_v6 = vld [vmem:[%s918_s28 + $0x9] ss:$0 sm:$0xff]  ;;  %v543_v14 = vld [vmem:[%s926_s29 + $0x10] sm:$0xff]  ;;  %s221_s3 = scalar_lea.vmem [#allocation7], %s525_s21  ;;  %s566_s8 = sshll.u32 %s772_s12, 9 }
  0x3f   : > { %v528_v3 = vld [vmem:[%s926_s29 + $0x20] sm:$0xff]  ;;  %v238_v4 = vmul.f32 %v529_v0, %v227_v2  ;;  %v258_v7 = vmul.f32 %v531_v1, %v227_v2  ;;  %v535_v9 = vld [vmem:[%s926_s29 + $0x8] sm:$0xff]  ;;  %v544_v19 = vld [vmem:[%s926_s29 + $0x30] sm:$0xff]  ;;  %s402_s7 = sshll.u32 %s221_s3, 4  ;;  %s969_s30 = scalar_lea.hbm %s1019_s2, %s566_s8  ;;  %s964_s7 = int_to_ptr.vmem [resolvable:$true] %s402_s7 }
  0x40   : > { %v537_v5 = vld [vmem:[%s918_s28 + $0x1] ss:$0 sm:$0xff]  ;;  %v250_v8 = vmul.f32 %v531_v1, %v528_v3  ;;  %v536_v10 = vld [vmem:[%s926_s29 + $0x28] sm:$0xff]  ;;  %v254_v11 = vmul.f32 %v529_v0, %v528_v3  ;;  %v545_v13 = vld [vmem:[%s918_s28 + $0x2] ss:$0 sm:$0xff]  ;;  %v298_v25 = vmul.f32 %v539_v6, %v535_v9  ;;  %s388_s4 = scalar_lea.sflag [#allocation4], %s914_s25 }
  0x41   : > { %v278_v12 = vmul.f32 %v537_v5, %v535_v9  ;;  %v294_v15 = vmul.f32 %v537_v5, %v536_v10  ;;  %v290_v17 = vmul.f32 %v539_v6, %v536_v10  ;;  %v547_v18 = vld [vmem:[%s918_s28 + $0xa] ss:$0 sm:$0xff]  ;;  %v553_v20 = vld [vmem:[%s918_s28 + $0x3] ss:$0 sm:$0xff]  ;;  %v530_v23 = vld [vmem:[%s918_s28 + $0x4] ss:$0 sm:$0xff]  ;;  %v318_v27 = vmul.f32 %v545_v13, %v543_v14 }
  0x42   : > { %v252_v16 = vsub.f32 %v238_v4, %v250_v8  ;;  %v260_v21 = vadd.f32 %v258_v7, %v254_v11  ;;  %v946_v22 = vld [vmem:[%s926_s29 + $0x18] sm:$0xff]  ;;  %v239_v28 = vmul.f32 %v530_v23, %v227_v2  ;;  %v538_v30 = vld [vmem:[%s918_s28 + $0x5] ss:$0 sm:$0xff]  ;;  %v546_v32 = vld [vmem:[%s918_s28 + $0x6] ss:$0 sm:$0xff]  ;;  %v330_v33 = vmul.f32 %v547_v18, %v544_v19  ;;  %s696_s6 = scalar_lea.vmem %s964_s7, 512 }
  0x43   : > { %v532_v24 = vld [vmem:[%s918_s28 + $0xc] ss:$0 sm:$0xff]  ;;  %v540_v31 = vld [vmem:[%s918_s28 + $0xd] ss:$0 sm:$0xff]  ;;  %v279_v34 = vmul.f32 %v538_v30, %v535_v9  ;;  %v334_v36 = vmul.f32 %v545_v13, %v544_v19  ;;  %v555_v38 = vld [vmem:[%s918_s28 + $0xb] ss:$0 sm:$0xff]  ;;  %v358_v40 = vmul.f32 %v553_v20, %v946_v22  ;;  %v319_v44 = vmul.f32 %v546_v32, %v543_v14  ;;  %p697_p8 = scmp.ne.s32.totalorder %s964_s7, %s696_s6 }
  0x44   : > { %v280_v26 = vadd.f32 %v278_v12, %v252_v16  ;;  %v251_v29 = vmul.f32 %v532_v24, %v528_v3  ;;  %v296_v35 = vadd.f32 %v294_v15, %v260_v21  ;;  %v552_v39 = vld [vmem:[%s926_s29 + $0x38] sm:$0xff]  ;;  %v291_v42 = vmul.f32 %v540_v31, %v536_v10  ;;  %v554_v50 = vld [vmem:[%s918_s28 + $0x7] ss:$0 sm:$0xff]  ;;  %s788_s12 = smov [#allocation7]  }
  0x45   : > { %v548_v43 = vld [vmem:[%s918_s28 + $0xe] ss:$0 sm:$0xff]  ;;  %v338_v46 = vmul.f32 %v547_v18, %v543_v14  ;;  %v255_v47 = vmul.f32 %v530_v23, %v528_v3  ;;  %v259_v51 = vmul.f32 %v532_v24, %v227_v2  ;;  %v295_v52 = vmul.f32 %v538_v30, %v536_v10  ;;  %v556_v59 = vld [vmem:[%s918_s28 + $0xf] ss:$0 sm:$0xff]  ;;  %p698_p0 = pnand %p697_p8, %p857_p9  ;;  %s700_s18 = sshll.u32 %s788_s12, 4  ;;  %s701_s18 = int_to_ptr.vmem [resolvable:$false] %s700_s18 }
  0x46   : > { %v292_v37 = vsub.f32 %v280_v26, %v290_v17  ;;  %v253_v41 = vsub.f32 %v239_v28, %v251_v29  ;;  %v300_v45 = vadd.f32 %v298_v25, %v296_v35  ;;  %v370_v53 = vmul.f32 %v555_v38, %v552_v39  ;;  %s702_s19 = scalar_lea.vmem %s701_s18, 1024  ;;  %p703_p5 = scmp.lt.s32.totalorder %s964_s7, %s701_s18 }
  0x47   : > { %v331_v54 = vmul.f32 %v548_v43, %v544_v19  ;;  %v374_v56 = vmul.f32 %v553_v20, %v552_v39  ;;  %v261_v60 = vadd.f32 %v259_v51, %v255_v47  ;;  %v299_v61 = vmul.f32 %v540_v31, %v535_v9  ;;  %p699_p2 = pneg %p698_p0  ;;  %p704_p6 = scmp.lt.s32.totalorder %s702_s19, %s696_s6 }
  0x48   : > { %v320_v48 = vadd.f32 %v318_v27, %v292_v37  ;;  %v281_v49 = vadd.f32 %v279_v34, %v253_v41  ;;  %v336_v55 = vadd.f32 %v334_v36, %v300_v45  ;;  %v359_v62 = vmul.f32 %v554_v50, %v946_v22 }
  0x49   : > { %v378_v0 = vmul.f32 %v555_v38, %v946_v22  ;;  %v297_v4 = vadd.f32 %v295_v52, %v261_v60  ;;  %v335_v2 = vmul.f32 %v546_v32, %v544_v19  ;;  %v371_v5 = vmul.f32 %v556_v59, %v552_v39  ;;  %p705_p4 = por %p704_p6, %p703_p5 }
  0x4a   : > { %v332_v57 = vsub.f32 %v320_v48, %v330_v33  ;;  %v293_v58 = vsub.f32 %v281_v49, %v291_v42  ;;  %v340_v63 = vadd.f32 %v338_v46, %v336_v55  ;;  %v339_v11 = vmul.f32 %v548_v43, %v543_v14 }
  0x4b   : > { %v301_v10 = vadd.f32 %v299_v61, %v297_v4  ;;  %v375_v15 = vmul.f32 %v554_v50, %v552_v39  ;;  %v379_v18 = vmul.f32 %v556_v59, %v946_v22  ;;  %p706_p7 = pnand %p705_p4, %p699_p2 }
  0x4c   : > { %v360_v1 = vadd.f32 %v358_v40, %v332_v57  ;;  %v321_v3 = vadd.f32 %v319_v44, %v293_v58  ;;  %v376_v6 = vadd.f32 %v374_v56, %v340_v63 }
  0x4d   : > { %v337_v13 = vadd.f32 %v335_v2, %v301_v10 }
  0x4e   : > { %v372_v7 = vsub.f32 %v360_v1, %v370_v53  ;;  %v333_v8 = vsub.f32 %v321_v3, %v331_v54  ;;  %v380_v12 = vadd.f32 %v378_v0, %v376_v6 }
  0x4f   : > { %v341_v17 = vadd.f32 %v339_v11, %v337_v13 }
  0x50   : > { %382 = vst [vmem:[%s221_s3] sm:$0xff] %v372_v7  ;;  %v361_v9 = vadd.f32 %v359_v62, %v333_v8  ;;  %557 = vst [vmem:[%s221_s3 + $0x10] sm:$0xff] %v380_v12 }
  0x51   : > { %v377_v19 = vadd.f32 %v375_v15, %v341_v17 }
  0x52   : > { %v373_v16 = vsub.f32 %v361_v9, %v371_v5 }
  0x53   : > { %v381_v14 = vadd.f32 %v379_v18, %v377_v19 }
  0x54   : > { %383 = vst [vmem:[%s221_s3 + $0x8] sm:$0xff] %v373_v16 }
  0x55   : > { %558 = vst [vmem:[%s221_s3 + $0x18] sm:$0xff] %v381_v14 }
  0x56   : > { %709 = shalt.err (!%p706_p7)
}
  0x57   : > { %s710_s20 = scalar_lea.hbm %s969_s30, 512  ;;  %s714_s5 = scalar_lea.hbm %s1019_s2, 1024 }
  0x58   : > { %p711_p1 = scmp.ne.s32.totalorder %s969_s30, %s710_s20  ;;  %p715_p3 = scmp.lt.s32.totalorder %s969_s30, %s1019_s2 }
  0x59   : > { %p716_p8 = scmp.lt.s32.totalorder %s714_s5, %s710_s20 }
  0x5a   : > { %p712_p10 = pnand %p711_p1, %p857_p9 }
  0x5b   : > { %p717_p0 = por %p716_p8, %p715_p3 }
  0x5c   : > { %p713_p13 = pneg %p712_p10 }
  0x5e   : > { %p718_p2 = pnand %p717_p0, %p713_p13 }
  0x60   : > { %721 = shalt.err (!%p718_p2)
}
  0x61   : > { %s789_s21 = smov 128   ;;  %s790_s3 = smov 8  }
  0x62   : > { %571 = dma.vmem_to_hbm [thread:$0]  (%p857_p9), %s964_s7, 512, %s969_s30, %s388_s4, %s789_s21, %s789_s21, %s790_s3  }
  0x63 PF: > { %s417_s8 = sand.u32 1, %s760_s9   ;;  %p581_p5 = pnand %p515_p12, %p864_p11 }
  0x64   : > { %s418_s15 = scalar_lea.sflag [#allocation4], %s417_s8 }
  0x65   : > { %p582_p6 = pneg %p581_p5 }
  0x67   : > { %755 = dma.done.wait (%p582_p6), %s418_s15, 512  }
  0x68   : > { %757 = vsyncadd (%p582_p6), %s418_s15, 4294966784  ;;  %s21_s14 = sadd.s32 1, %s780_s14   ;;  %s1026_s9 = smov %s764_s10 }
  0x69   : > { %p18_p4 = scmp.ge.s32.totalorder %s21_s14, 4   ;;  %s1027_s10 = smov %s768_s11 }
  0x6a   : > { %s1028_s11 = smov %s862_s23  ;;  %s1029_s12 = smov %s776_s13 }
  0x6b   : > { %s1030_s13 = smov %s1032_s17  ;;  %20 = sbr.rel (!%p18_p4) target bundleno = 8 (0x8), region = 95 }
  0x70   :  { %423 = vsyncpa [#allocation3], 1 }
  0x71   :  { %425 = vsyncpa [#allocation3 + $0x1], 1 }
  0x72   :  { %426 = vsyncpa [#allocation6], 1 }
  0x73   :  { %428 = vsyncpa [#allocation6 + $0x1], 1 }
  0x74   :  { %429 = vsyncpa [#allocation4], 1 }
  0x75   :  { %431 = vsyncpa [#allocation4 + $0x1], 1 }

</bundles_post_ra>
